<compile_context>
chip_gen: v7x
topology: tpu7x:2x2x1
jax: 0.10.0
libtpu: 0.0.40
codegen_flags: <defaults>
</compile_context>

<pallas_src>
import jax
import jax.numpy as jnp
from jax.experimental import pallas as pl
from jax.experimental.pallas import tpu as pltpu

_MIB = 1024 * 1024
_RESIDENT_W_BUDGET = 8 * _MIB       # weight-resident ceiling, safe on all chips
_RESIDENT_TOTAL_BUDGET = 24 * _MIB  # total buffer budget for the resident path
_VMEM_LIMIT_CAP = 48 * _MIB         # below v7x's 64 MiB physical VMEM


def _round_up(x, m):
    return ((x + m - 1) // m) * m


def _sublane_multiple(dtype):
    # f32 -> 8, bf16/f16 -> 16, int8/fp8 -> 32.
    return max(8, 32 // jnp.dtype(dtype).itemsize)


# ------------------------------- kernels -------------------------------------

def _slp_resident_kernel(x_ref, w_ref, o_ref):
    # x_ref: [tm, K], w_ref: [K, N] (pre-transposed weight, resident in VMEM),
    # o_ref: [tm, N].  One MXU matmul per M tile, f32 accumulation.
    o_ref[...] = jnp.dot(
        x_ref[...], w_ref[...], preferred_element_type=jnp.float32
    ).astype(o_ref.dtype)


def _slp_tiled_kernel_f32out(x_ref, w_ref, o_ref):
    # f32 output: accumulate directly into the (k-resident) output block.
    @pl.when(pl.program_id(2) == 0)
    def _():
        o_ref[...] = jnp.zeros_like(o_ref)

    o_ref[...] += jnp.dot(x_ref[...], w_ref[...], preferred_element_type=jnp.float32)


def _slp_tiled_kernel_acc(x_ref, w_ref, o_ref, acc_ref):
    # Low-precision output: f32 VMEM scratch accumulator, cast on the last k.
    @pl.when(pl.program_id(2) == 0)
    def _():
        acc_ref[...] = jnp.zeros_like(acc_ref)

    acc_ref[...] += jnp.dot(x_ref[...], w_ref[...], preferred_element_type=jnp.float32)

    @pl.when(pl.program_id(2) == pl.num_programs(2) - 1)
    def _():
        o_ref[...] = acc_ref[...].astype(o_ref.dtype)


# ------------------------------- wrapper --------------------------------------

def slp_forward(x, weight, *, tm=512, tn=512, tk=1024, force_tiled=False):
    """SLPNet forward: y = x @ weight.T.

    x:      [B, In]
    weight: [Out, In]   (PyTorch nn.Linear convention, bias=False)
    """
    B, In = x.shape
    Out, In_w = weight.shape
    assert In == In_w, "weight inner dim must match x feature dim"

    dtype = x.dtype
    out_dtype = x.dtype
    itemsize = jnp.dtype(dtype).itemsize
    sub = _sublane_multiple(dtype)

    # One-time weight prep: transpose to [In, Out] (no in-kernel transpose).
    wt = weight.T.astype(dtype)

    Inp = _round_up(In, 128)
    Outp = _round_up(Out, 128)
    tm = min(tm, _round_up(B, sub))

    # ---------------- resident-weight path ----------------
    w_bytes = Inp * Outp * itemsize
    resident_bytes = (
        2 * w_bytes                                      # W (double-buffer worst case)
        + 2 * tm * Inp * itemsize                        # x block, double-buffered
        + 2 * tm * Outp * jnp.dtype(out_dtype).itemsize  # out block, double-buffered
    )
    use_resident = (
        (not force_tiled)
        and w_bytes <= _RESIDENT_W_BUDGET
        and resident_bytes <= _RESIDENT_TOTAL_BUDGET
    )

    if use_resident:
        Bp = _round_up(B, tm)
        xp = x if (Bp, Inp) == (B, In) else jnp.pad(x, ((0, Bp - B), (0, Inp - In)))
        wp = wt if (Inp, Outp) == (In, Out) else jnp.pad(
            wt, ((0, Inp - In), (0, Outp - Out)))

        cost = pl.CostEstimate(
            flops=2 * Bp * Inp * Outp,
            transcendentals=0,
            bytes_accessed=(Bp * Inp + Inp * Outp + Bp * Outp) * itemsize,
        )
        vmem_limit = int(min(max(2 * resident_bytes, 32 * _MIB), _VMEM_LIMIT_CAP))

        yp = pl.pallas_call(
            _slp_resident_kernel,
            out_shape=jax.ShapeDtypeStruct((Bp, Outp), out_dtype),
            grid_spec=pltpu.PrefetchScalarGridSpec(
                num_scalar_prefetch=0,
                grid=(Bp // tm,),
                in_specs=[
                    pl.BlockSpec((tm, Inp), lambda i: (i, 0)),     # x M-tile
                    pl.BlockSpec((Inp, Outp), lambda i: (0, 0)),   # W resident (DMA once)
                ],
                out_specs=pl.BlockSpec((tm, Outp), lambda i: (i, 0)),
            ),
            compiler_params=pltpu.CompilerParams(
                dimension_semantics=("parallel",),
                vmem_limit_bytes=vmem_limit,
            ),
            cost_estimate=cost,
        )(xp, wp)
        return yp[:B, :Out]

    # ---------------- tiled (M, N, K) path ----------------
    tn = min(tn, Outp)
    tk = min(tk, Inp)

    # v7x has 2 TensorCores: if M collapses to one block, give N >= 2 blocks.
    if _round_up(B, tm) // tm == 1 and Outp >= 256 and Outp // tn < 2:
        tn = _round_up(Outp // 2, 128)

    Bp = _round_up(B, tm)
    Outp = _round_up(Out, tn)
    Inp = _round_up(In, tk)

    xp = x if (Bp, Inp) == (B, In) else jnp.pad(x, ((0, Bp - B), (0, Inp - In)))
    wp = wt if (Inp, Outp) == (In, Out) else jnp.pad(
        wt, ((0, Inp - In), (0, Outp - Out)))

    grid = (Bp // tm, Outp // tn, Inp // tk)

    is_f32_out = jnp.dtype(out_dtype) == jnp.dtype(jnp.float32)
    tiled_bytes = (
        2 * tm * tk * itemsize                            # x blocks
        + 2 * tk * tn * itemsize                          # W blocks
        + 2 * tm * tn * jnp.dtype(out_dtype).itemsize     # out blocks
        + (0 if is_f32_out else tm * tn * 4)              # f32 acc scratch
    )
    vmem_limit = int(min(max(2 * tiled_bytes, 32 * _MIB), _VMEM_LIMIT_CAP))

    cost = pl.CostEstimate(
        flops=2 * Bp * Inp * Outp,
        transcendentals=0,
        bytes_accessed=(Bp * Inp * (Outp // tn)      # x re-streamed per N block
                        + Inp * Outp * (Bp // tm)    # W re-streamed per M block
                        + Bp * Outp) * itemsize,
    )

    if is_f32_out:
        kernel, scratch = _slp_tiled_kernel_f32out, []
    else:
        kernel, scratch = _slp_tiled_kernel_acc, [pltpu.VMEM((tm, tn), jnp.float32)]

    yp = pl.pallas_call(
        kernel,
        out_shape=jax.ShapeDtypeStruct((Bp, Outp), out_dtype),
        grid_spec=pltpu.PrefetchScalarGridSpec(
            num_scalar_prefetch=0,
            grid=grid,
            in_specs=[
                pl.BlockSpec((tm, tk), lambda i, j, k: (i, k)),   # x tile
                pl.BlockSpec((tk, tn), lambda i, j, k: (k, j)),   # W^T tile
            ],
            out_specs=pl.BlockSpec((tm, tn), lambda i, j, k: (i, j)),
            scratch_shapes=scratch,
        ),
        compiler_params=pltpu.CompilerParams(
            dimension_semantics=("parallel", "parallel", "arbitrary"),
            vmem_limit_bytes=vmem_limit,
        ),
        cost_estimate=cost,
    )(xp, wp)

    return yp[:B, :Out]


if __name__ == "__main__":
    # Shapes consistent with nn.Linear(input_size, output_size, bias=False).
    batch, input_size, output_size = 8, 32, 16

    key = jax.random.PRNGKey(0)
    kx, kw = jax.random.split(key)
    x = jax.random.normal(kx, (batch, input_size), dtype=jnp.float32)
    # nn.init.normal_(weight, 0.0, 1.0) -> standard normal, shape [out, in].
    weight = jax.random.normal(kw, (output_size, input_size), dtype=jnp.float32)

    y_ref = x @ weight.T

    # Resident-weight path (default for small weights).
    y = slp_forward(x, weight)
    jax.block_until_ready(y)
    assert y.shape == (batch, output_size)
    assert jnp.allclose(y, y_ref, atol=1e-5, rtol=1e-5)

    # Tiled (M, N, K) path, exercised explicitly for coverage.
    y_t = slp_forward(x, weight, force_tiled=True)
    jax.block_until_ready(y_t)
    assert y_t.shape == (batch, output_size)
    assert jnp.allclose(y_t, y_ref, atol=1e-5, rtol=1e-5)

    print("KERNEL_OK")
</pallas_src>

<mosaic_0001>
module attributes {stable_mosaic.version = 11 : i64} {
  func.func @_slp_resident_kernel(%arg0: i32, %arg1: memref<8x128xf32, #tpu.memory_space<vmem>>, %arg2: memref<128x128xf32, #tpu.memory_space<vmem>>, %arg3: memref<8x128xf32, #tpu.memory_space<vmem>>) attributes {dimension_semantics = [#tpu.dimension_semantics<parallel>], iteration_bounds = array<i64: 1>, scalar_prefetch = 0 : i64, scratch_operands = 0 : i64, tpu.core_type = #tpu.core_type<tc>, window_params = [{transform_indices = @transform_0, window_bounds = array<i64: 8, 128>}, {pipeline_mode = #tpu.pipeline_mode<synchronous>, transform_indices = @transform_1, window_bounds = array<i64: 128, 128>}, {transform_indices = @transform_2, window_bounds = array<i64: 8, 128>}]} {
    %c0 = arith.constant 0 : index
    %c0_0 = arith.constant 0 : index
    %0 = vector.load %arg1[%c0, %c0_0] : memref<8x128xf32, #tpu.memory_space<vmem>>, vector<8x128xf32>
    %c0_1 = arith.constant 0 : index
    %c0_2 = arith.constant 0 : index
    %1 = vector.load %arg2[%c0_1, %c0_2] : memref<128x128xf32, #tpu.memory_space<vmem>>, vector<128x128xf32>
    %cst = arith.constant dense<0.000000e+00> : vector<8x128xf32>
    %2 = tpu.matmul %0, %1, %cst {dimension_numbers = #tpu.dot_dimension_numbers<[1], [0], [0], [1], [0, 0, 1, 1], [], []>} : vector<8x128xf32>, vector<128x128xf32>, vector<8x128xf32> -> vector<8x128xf32>
    %c0_3 = arith.constant 0 : index
    %c0_4 = arith.constant 0 : index
    %3 = vector.load %arg3[%c0_3, %c0_4] : memref<8x128xf32, #tpu.memory_space<vmem>>, vector<8x128xf32>
    tpu.vector_store %arg3[%c0_3, %c0_4], %2 {strides = array<i32>} : memref<8x128xf32, #tpu.memory_space<vmem>>, vector<8x128xf32>,
    return
  }
  func.func @transform_0(%arg0: i32) -> (i32, i32) {
    %c0_i32 = arith.constant 0 : i32
    %c0_i32_0 = arith.constant 0 : i32
    return %arg0, %c0_i32 : i32, i32
  }
  func.func @transform_1(%arg0: i32) -> (i32, i32) {
    %c0_i32 = arith.constant 0 : i32
    %c0_i32_0 = arith.constant 0 : i32
    %c0_i32_1 = arith.constant 0 : i32
    return %c0_i32, %c0_i32_0 : i32, i32
  }
  func.func @transform_2(%arg0: i32) -> (i32, i32) {
    %c0_i32 = arith.constant 0 : i32
    %c0_i32_0 = arith.constant 0 : i32
    return %arg0, %c0_i32 : i32, i32
  }
}

</mosaic_0001>

<bundles_post_ra>
// kernel: tpu_custom_call.1
= control target key start
LH: loop header
LB: loop body
LE: loop exit
PB: predicated region body
PF: predicated region fallthrough
CT: control target
= control target key end

     0   :  { %7 = vsyncpa [#allocation3], 0  ;;  %s364_s0 = inlined_call_operand.hbm [shape: f32[8,128], index: 0, kind: input, shape index: {}]   ;;  %s365_s1 = inlined_call_operand.hbm [shape: f32[128,128], index: 1, kind: input, shape index: {}]   ;;  %s366_s2 = inlined_call_operand.hbm [shape: f32[8,128], index: 2, kind: output, shape index: {}]  }
   0x1   :  { %8 = vsyncpa [#allocation6], 0 }
   0x2   :  { %9 = vsyncpa [#allocation4], 0  ;;  %s298_s9 = smov [#allocation2]   ;;  %s299_s11 = smov [#allocation5]  }
   0x3   :  { %s16_s10 = sshll.u32 %s298_s9, 4  ;;  %s25_s12 = sshll.u32 %s299_s11, 4  ;;  %s17_s10 = int_to_ptr.vmem [resolvable:$true] %s16_s10  ;;  %s321_s12 = int_to_ptr.vmem [resolvable:$true] %s25_s12 }
   0x4   :  { %s226_s15 = scalar_lea.hbm %s364_s0, 128 }
   0x5   :  { %p227_p0 = scmp.ne.s32.totalorder %s364_s0, %s226_s15  ;;  %p230_p1 = scmp.lt.u32.totalorder %s226_s15, %s364_s0 }
   0x7   :  { %p232_p2 = pnand %p230_p1, %p227_p0 }
   0x9   :  { %235 = shalt.err (!%p232_p2)
}
   0xa   :  { %s236_s20 = scalar_lea.vmem %s17_s10, 128  ;;  %p241_p4 = scmp.lt.s32.totalorder %s17_s10, %s17_s10 }
   0xb   :  { %p237_p3 = scmp.ne.s32.totalorder %s17_s10, %s236_s20  ;;  %p242_p5 = scmp.lt.s32.totalorder %s236_s20, %s236_s20 }
   0xd   :  { %p243_p6 = por %p242_p5, %p241_p4 }
   0xf   :  { %p244_p7 = pnand %p243_p6, %p237_p3 }
  0x11   :  { %247 = shalt.err (!%p244_p7)
}
  0x12   :  { %19 = dma.hbm_to_vmem [thread:$0]  %s364_s0, 128, %s17_s10, [#allocation3]  }
  0x13   :  { %s248_s25 = scalar_lea.hbm %s365_s1, 2048 }
  0x14   :  { %p249_p8 = scmp.ne.s32.totalorder %s365_s1, %s248_s25  ;;  %p252_p9 = scmp.lt.u32.totalorder %s248_s25, %s365_s1 }
  0x16   :  { %p254_p10 = pnand %p252_p9, %p249_p8 }
  0x18   :  { %257 = shalt.err (!%p254_p10)
}
  0x19   :  { %s258_s30 = scalar_lea.vmem %s321_s12, 2048  ;;  %p263_p12 = scmp.lt.s32.totalorder %s321_s12, %s321_s12 }
  0x1a   :  { %p259_p11 = scmp.ne.s32.totalorder %s321_s12, %s258_s30  ;;  %p264_p13 = scmp.lt.s32.totalorder %s258_s30, %s258_s30 }
  0x1c   :  { %p265_p0 = por %p264_p13, %p263_p12 }
  0x1e   :  { %p266_p1 = pnand %p265_p0, %p259_p11 }
  0x20   :  { %269 = shalt.err (!%p266_p1)
}
  0x21   :  { %s300_s0 = smov 128   ;;  %s301_s3 = smov 8  }
  0x22   :  { %31 = dma.hbm_to_vmem [thread:$0]  %s365_s1, 2048, %s321_s12, [#allocation6], %s300_s0, %s300_s0, %s301_s3  }
  0x23   :  { %292 = dma.done.wait [#allocation3], 128  }
  0x24   :  { %293 = vsyncadd [#allocation3], 4294967168 }
  0x25   :  { %294 = dma.done.wait [#allocation6], 2048  }
  0x26   :  { %295 = vsyncadd [#allocation6], 4294965248  ;;  %v302_v0 = vmov 0.0|0.0   ;;  %vm303_vm0 = vmmov 0   ;;  %v304_v1 = vmov 0.0   ;;  %v39_v2 = vld [vmem:[#allocation5] sm:$0xff] }
  0x27   :  { %194 = vmatprep.subr.bf16.mxu0 %v302_v0  ;;  %191 = vmatprep.mubr.msk.f32.mxu0 %vm303_vm0, %v304_v1  ;;  %v40_v3 = vld [vmem:[#allocation5 + $0x8] sm:$0xff]  ;;  %v41_v4 = vld [vmem:[#allocation5 + $0x10] sm:$0xff]  ;;  %v42_v6 = vld [vmem:[#allocation5 + $0x18] sm:$0xff]  ;;  %s305_s1 = smov [#allocation7]  }
  0x28   :  { %v195_v5 = vpack.c.bf16 %v40_v3, %v39_v2  ;;  %v198_v7 = vpack.c.bf16 %v42_v6, %v41_v4  ;;  %v43_v8 = vld [vmem:[#allocation5 + $0x20] sm:$0xff]  ;;  %v44_v9 = vld [vmem:[#allocation5 + $0x28] sm:$0xff]  ;;  %v45_v11 = vld [vmem:[#allocation5 + $0x30] sm:$0xff]  ;;  %s132_s6 = sshll.u32 %s305_s1, 4  ;;  %s133_s6 = int_to_ptr.vmem [resolvable:$true] %s132_s6 }
  0x29   :  { %v201_v10 = vpack.c.bf16 %v44_v9, %v43_v8  ;;  %v46_v12 = vld [vmem:[#allocation5 + $0x38] sm:$0xff]  ;;  %v47_v14 = vld [vmem:[#allocation5 + $0x40] sm:$0xff]  ;;  %v48_v15 = vld [vmem:[#allocation5 + $0x48] sm:$0xff]  ;;  %s270_s7 = scalar_lea.vmem %s133_s6, 128  ;;  %p275_p3 = scmp.lt.s32.totalorder %s133_s6, %s133_s6 }
  0x2a   :  { %196 = vmatpush3.bf16.msra.mxu0 %v195_v5  ;;  %v204_v13 = vpack.c.bf16 %v46_v12, %v45_v11  ;;  %v207_v16 = vpack.c.bf16 %v48_v15, %v47_v14  ;;  %v49_v17 = vld [vmem:[#allocation5 + $0x50] sm:$0xff]  ;;  %v50_v18 = vld [vmem:[#allocation5 + $0x58] sm:$0xff]  ;;  %v51_v20 = vld [vmem:[#allocation5 + $0x60] sm:$0xff]  ;;  %p271_p2 = scmp.ne.s32.totalorder %s133_s6, %s270_s7  ;;  %p276_p4 = scmp.lt.s32.totalorder %s270_s7, %s270_s7 }
  0x2b   :  { %197 = vmatprep.subr.bf16.mxu0 %v302_v0  ;;  %v210_v19 = vpack.c.bf16 %v50_v18, %v49_v17  ;;  %v52_v21 = vld [vmem:[#allocation5 + $0x68] sm:$0xff]  ;;  %v53_v23 = vld [vmem:[#allocation5 + $0x70] sm:$0xff]  ;;  %v54_v24 = vld [vmem:[#allocation5 + $0x78] sm:$0xff] }
  0x2c   :  { %v213_v22 = vpack.c.bf16 %v52_v21, %v51_v20  ;;  %v216_v25 = vpack.c.bf16 %v54_v24, %v53_v23  ;;  %v38_v26 = vld [vmem:[#allocation2] sm:$0xff]  ;;  %p277_p5 = por %p276_p4, %p275_p3 }
  0x2e   :  { %199 = vmatpush3.bf16.msra.mxu0 %v198_v7  ;;  %p278_p6 = pnand %p277_p5, %p271_p2 }
  0x2f   :  { %200 = vmatprep.subr.bf16.mxu0 %v302_v0 }
  0x32   :  { %202 = vmatpush3.bf16.msra.mxu0 %v201_v10 }
  0x33   :  { %203 = vmatprep.subr.bf16.mxu0 %v302_v0 }
  0x36   :  { %205 = vmatpush3.bf16.msra.mxu0 %v204_v13 }
  0x37   :  { %206 = vmatprep.subr.bf16.mxu0 %v302_v0 }
  0x3a   :  { %208 = vmatpush3.bf16.msra.mxu0 %v207_v16 }
  0x3b   :  { %209 = vmatprep.subr.bf16.mxu0 %v302_v0 }
  0x3e   :  { %211 = vmatpush3.bf16.msra.mxu0 %v210_v19 }
  0x3f   :  { %212 = vmatprep.subr.bf16.mxu0 %v302_v0 }
  0x42   :  { %214 = vmatpush3.bf16.msra.mxu0 %v213_v22 }
  0x43   :  { %215 = vmatprep.subr.bf16.mxu0 %v302_v0 }
  0x46   :  { %217 = vmatpush3.bf16.msra.mxu0 %v216_v25 }
  0x49   :  { %192 = vmatmul.mubr.f32.vlgmr.msra.gmra.mrb[0].mxu0 %v38_v26 }
 0x11c   :  { %v121_v27 = vpop.f32.mrb[0].mxu0 }
 0x11d   :  { %125 = vst [vmem:[#allocation7] sm:$0xff] %v121_v27  ;;  %v193_v28 = vpop.f32.mrb[1].mxu0 }
 0x11e   :  { %281 = shalt.err (!%p278_p6)
}
 0x11f   :  { %s282_s10 = scalar_lea.hbm %s366_s2, 128 }
 0x120   :  { %p283_p7 = scmp.ne.s32.totalorder %s366_s2, %s282_s10  ;;  %p286_p8 = scmp.lt.u32.totalorder %s282_s10, %s366_s2 }
 0x122   :  { %p288_p9 = pnand %p286_p8, %p283_p7 }
 0x124   :  { %291 = shalt.err (!%p288_p9)
}
 0x125   :  { %135 = dma.vmem_to_hbm [thread:$0]  %s133_s6, 128, %s366_s2, [#allocation4]  }
 0x126   :  { %296 = dma.done.wait [#allocation4], 128  }
 0x127   :  { %297 = vsyncadd [#allocation4], 4294967168 }
 0x128   :  { %139 = vsyncpa [#allocation3], 1 }
 0x129   :  { %140 = vsyncpa [#allocation6], 1 }
 0x12a   :  { %141 = vsyncpa [#allocation4], 1 }

</bundles_post_ra>
